<compile_context>
chip_gen: v7x
topology: tpu7x:2x2x1
jax: 0.10.0
libtpu: 0.0.40
codegen_flags: <defaults>
</compile_context>

<pallas_src>
import functools
import math

import jax
import jax.numpy as jnp
from jax.experimental import pallas as pl
from jax.experimental.pallas import tpu as pltpu


def _round_up(x, m):
    return (x + m - 1) // m * m


def _conv3x3_s2_kernel(x_ref, w_ref, b_ref, o_ref, acc_ref, *, th):
    """One (batch, output-row-block) step of a 3x3 / stride-2 / pad-1 conv.

    x_ref  : (1, 2, rows, cols, 3*C_in) bf16 row-phase planes; the last dim
             stacks the 3 column taps (kw = 0,1,2) of every output pixel.
    w_ref  : (3, 3*C_in, C_out) bf16, w_ref[kh][kw*C_in + c] == w[kh, kw, c]
    b_ref  : (1, C_out) f32 bias
    o_ref  : (1, th, w_out, C_out) output row block
    acc_ref: (th*w_out, C_out) f32 VMEM accumulator scratch
    """
    r = pl.program_id(1)
    w_out = o_ref.shape[2]
    c_out = o_ref.shape[-1]
    k3 = x_ref.shape[-1]                       # 3 * C_in
    row0 = r * th

    # Row-phase planes for this block.  ph=0 serves kh=0 (rows row0..) and
    # kh=2 (rows row0+1..); ph=1 serves kh=1.  Single unit-stride loads.
    plane0 = x_ref[0, 0, pl.ds(row0, th + 1), :, :]        # (th+1, cols, 3*C_in)
    plane1 = x_ref[0, 1, pl.ds(row0, th), :, :]            # (th,   cols, 3*C_in)

    windows = (
        plane0[0:th, 0:w_out, :],        # kh = 0
        plane1[:, 0:w_out, :],           # kh = 1
        plane0[1:th + 1, 0:w_out, :],    # kh = 2
    )

    for kh in range(3):
        patch = windows[kh].reshape(th * w_out, k3)         # bf16 MXU operand
        contrib = jnp.dot(patch, w_ref[kh],
                          preferred_element_type=jnp.float32)
        if kh == 0:
            acc_ref[...] = contrib
        else:
            acc_ref[...] = acc_ref[...] + contrib

    out = acc_ref[...] + b_ref[...]                         # f32 bias broadcast
    o_ref[0] = out.reshape(th, w_out, c_out).astype(o_ref.dtype)


def _row_phase_colstack_planes(x, *, layout, rows, cols, apply_relu, out_dtype):
    """Build the kernel input: (N, 2, rows, cols, 3*C) planes where
    planes[:, ph, i, j, kw*C:(kw+1)*C] == relu?(x)_pad1[:, 2i+ph, 2j+kw, :].

    Pure layout + elementwise work done once in XLA (fuses the optional
    NCHW->NHWC transpose, ReLU, zero padding, stride-2 slicing, bf16 cast).
    """
    if layout == "NCHW":
        x = jnp.transpose(x, (0, 2, 3, 1))
    if apply_relu:
        x = jnp.maximum(x, 0)                   # relu(pad(x)) == pad(relu(x))
    n, h, w, c = x.shape
    hp, wp = 2 * rows, 2 * cols + 1
    xp = jnp.pad(x, ((0, 0), (1, hp - h - 1), (1, wp - w - 1), (0, 0)))
    planes = []
    for ph in range(2):
        taps = [xp[:, ph:ph + 2 * rows:2, kw:kw + 2 * cols:2, :]
                for kw in range(3)]
        planes.append(jnp.concatenate(taps, axis=-1))       # (n, rows, cols, 3c)
    return jnp.stack(planes, axis=1).astype(out_dtype)      # (n, 2, rows, cols, 3c)


def _pack_weights(w_hwio, dtype):
    """(3, 3, C_in, C_out) HWIO -> (3, 3*C_in, C_out), kw stacked along K."""
    _, _, c_in, c_out = w_hwio.shape
    return w_hwio.reshape(3, 3 * c_in, c_out).astype(dtype)


def conv3x3_s2(x, w_hwio, bias, *, layout="NHWC", apply_relu=False,
               target_rows=256, compute_dtype=jnp.bfloat16):
    """3x3 / stride-2 / pad-1 conv (+ optional fused input ReLU) on TPU.

    Accepts NCHW or NHWC input, returns NHWC.  Grid = (batch, output-row
    blocks); the row-phase planes are VMEM-resident across the row axis of
    each batch element.  target_rows ~ 256 fills the v6e/v7x MXU (128 is
    enough for v5e).
    """
    if layout == "NCHW":
        n, c_in, h, w = x.shape
    else:
        n, h, w, c_in = x.shape
    c_out = w_hwio.shape[-1]
    h_out = (h - 1) // 2 + 1                    # == floor((h + 2 - 3) / 2) + 1
    w_out = (w - 1) // 2 + 1

    # Row-block size targeting ~target_rows MXU rows per matmul; ragged h_out
    # is handled by zero-padded plane/output rows + a post-slice.
    th = max(1, min(h_out, target_rows // max(w_out, 1)))
    if n == 1 and h_out >= 2:
        th = min(th, -(-h_out // 2))            # >=2 row blocks -> both v7x TCs
    nrb = pl.cdiv(h_out, th)
    rows = nrb * th + 1
    cols = _round_up(w_out + 1, 8)              # sublane-aligned plane width

    planes = _row_phase_colstack_planes(
        x, layout=layout, rows=rows, cols=cols,
        apply_relu=apply_relu, out_dtype=compute_dtype)
    w_packed = _pack_weights(w_hwio, compute_dtype)
    bias2 = jnp.asarray(bias, jnp.float32).reshape(1, c_out)
    out_dtype = x.dtype

    flops = int(2 * n * h_out * w_out * 9 * c_in * c_out)
    bytes_accessed = int(
        planes.size * planes.dtype.itemsize
        + w_packed.size * w_packed.dtype.itemsize
        + n * nrb * th * w_out * c_out * x.dtype.itemsize)

    out = pl.pallas_call(
        functools.partial(_conv3x3_s2_kernel, th=th),
        out_shape=jax.ShapeDtypeStruct((n, nrb * th, w_out, c_out), out_dtype),
        grid_spec=pltpu.PrefetchScalarGridSpec(
            num_scalar_prefetch=0,
            grid=(n, nrb),
            in_specs=[
                # Planes: block index ignores the row axis -> DMA'd once per
                # batch element, resident in VMEM across all row blocks.
                pl.BlockSpec((1, 2, rows, cols, 3 * c_in),
                             lambda b, r: (b, 0, 0, 0, 0)),
                pl.BlockSpec((3, 3 * c_in, c_out), lambda b, r: (0, 0, 0)),
                pl.BlockSpec((1, c_out), lambda b, r: (0, 0)),
            ],
            out_specs=pl.BlockSpec((1, th, w_out, c_out),
                                   lambda b, r: (b, r, 0, 0)),
            scratch_shapes=[pltpu.VMEM((th * w_out, c_out), jnp.float32)],
        ),
        compiler_params=pltpu.CompilerParams(
            dimension_semantics=("parallel", "parallel"),
            vmem_limit_bytes=64 * 1024 * 1024),
        cost_estimate=pl.CostEstimate(flops=flops, transcendentals=0,
                                      bytes_accessed=bytes_accessed),
    )(planes, w_packed, bias2)

    if nrb * th != h_out:
        out = out[:, :h_out]
    return out                                   # NHWC


def last_level_p6p7_p5(c5_nchw, w6, b6, w7, b7, *, compute_dtype=jnp.bfloat16):
    """Forward pass of LastLevelP6P7_P5; input and outputs are NCHW (PyTorch)."""
    p6 = conv3x3_s2(c5_nchw, w6, b6, layout="NCHW", apply_relu=False,
                    compute_dtype=compute_dtype)                   # NHWC
    p7 = conv3x3_s2(p6, w7, b7, layout="NHWC", apply_relu=True,
                    compute_dtype=compute_dtype)                   # NHWC
    return [jnp.transpose(p6, (0, 3, 1, 2)), jnp.transpose(p7, (0, 3, 1, 2))]


def _ref_conv_nchw(x_nchw, w_hwio, bias, *, apply_relu=False,
                   compute_dtype=jnp.bfloat16):
    """XLA reference at matching precision (bf16 operands, f32 accumulation)."""
    x = jnp.maximum(x_nchw, 0) if apply_relu else x_nchw
    y = jax.lax.conv_general_dilated(
        x.astype(compute_dtype), w_hwio.astype(compute_dtype),
        window_strides=(2, 2), padding=((1, 1), (1, 1)),
        dimension_numbers=("NCHW", "HWIO", "NCHW"),
        preferred_element_type=jnp.float32)
    return y + jnp.asarray(bias, jnp.float32).reshape(1, -1, 1, 1)


if __name__ == "__main__":
    # Small shapes consistent with the module: c5 is NCHW.
    N, C_IN, H, W = 2, 4, 16, 16
    C_OUT = 8

    key = jax.random.PRNGKey(0)
    k_x, k_w6, k_w7, k_b6, k_b7 = jax.random.split(key, 5)

    c5 = jax.random.normal(k_x, (N, C_IN, H, W), jnp.float32)

    # kaiming_uniform(a=1)-style weights (c2_xavier_fill); small random biases
    # (PyTorch init zeros them, but nonzero exercises the bias path).
    bound6 = math.sqrt(3.0 / (9 * C_IN))
    bound7 = math.sqrt(3.0 / (9 * C_OUT))
    w6 = jax.random.uniform(k_w6, (3, 3, C_IN, C_OUT), jnp.float32, -bound6, bound6)
    w7 = jax.random.uniform(k_w7, (3, 3, C_OUT, C_OUT), jnp.float32, -bound7, bound7)
    b6 = 0.1 * jax.random.normal(k_b6, (C_OUT,), jnp.float32)
    b7 = 0.1 * jax.random.normal(k_b7, (C_OUT,), jnp.float32)

    p6, p7 = last_level_p6p7_p5(c5, w6, b6, w7, b7)
    jax.block_until_ready(p6)
    jax.block_until_ready(p7)

    # References at matching precision.  p7's reference is fed from the
    # kernel's own p6 so only the second conv is being checked.
    p6_ref = _ref_conv_nchw(c5, w6, b6, apply_relu=False)
    p7_ref = _ref_conv_nchw(p6, w7, b7, apply_relu=True)

    assert p6.shape == (N, C_OUT, H // 2, W // 2), p6.shape
    assert p7.shape == (N, C_OUT, H // 4, W // 4), p7.shape
    # Identical bf16 products, f32 accumulation on both sides -> differences
    # are accumulation-order level only.
    assert jnp.allclose(p6, p6_ref, atol=1e-2, rtol=1e-2)
    assert jnp.allclose(p7, p7_ref, atol=1e-2, rtol=1e-2)

    print("KERNEL_OK")
</pallas_src>

<mosaic_0001>
module attributes {stable_mosaic.version = 11 : i64} {
  func.func @_conv3x3_s2_kernel(%arg0: i32, %arg1: i32, %arg2: memref<1x2x9x16x12xbf16, #tpu.memory_space<vmem>>, %arg3: memref<3x12x8xbf16, #tpu.memory_space<vmem>>, %arg4: memref<1x8xf32, #tpu.memory_space<vmem>>, %arg5: memref<1x8x8x8xf32, #tpu.memory_space<vmem>>, %arg6: memref<64x8xf32, #tpu.memory_space<vmem>>) attributes {dimension_semantics = [#tpu.dimension_semantics<parallel>, #tpu.dimension_semantics<parallel>], iteration_bounds = array<i64: 2, 1>, scalar_prefetch = 0 : i64, scratch_operands = 1 : i64, tpu.core_type = #tpu.core_type<tc>, window_params = [{transform_indices = @transform_0, window_bounds = array<i64: 1, 2, 9, 16, 12>}, {pipeline_mode = #tpu.pipeline_mode<synchronous>, transform_indices = @transform_1, window_bounds = array<i64: 3, 12, 8>}, {pipeline_mode = #tpu.pipeline_mode<synchronous>, transform_indices = @transform_2, window_bounds = array<i64: 1, 8>}, {transform_indices = @transform_3, window_bounds = array<i64: 1, 8, 8, 8>}]} {
    %c8_i32 = arith.constant 8 : i32
    %0 = arith.muli %arg1, %c8_i32 : i32
    %c0 = arith.constant 0 : index
    %c0_0 = arith.constant 0 : index
    %1 = arith.index_cast %0 : i32 to index
    %c0_1 = arith.constant 0 : index
    %c0_2 = arith.constant 0 : index
    %2 = vector.load %arg2[%c0, %c0_0, %1, %c0_1, %c0_2] : memref<1x2x9x16x12xbf16, #tpu.memory_space<vmem>>, vector<1x1x9x16x12xbf16>
    %3 = vector.shape_cast %2 : vector<1x1x9x16x12xbf16> to vector<9x16x12xbf16>
    %c0_3 = arith.constant 0 : index
    %c1 = arith.constant 1 : index
    %4 = arith.index_cast %0 : i32 to index
    %c0_4 = arith.constant 0 : index
    %c0_5 = arith.constant 0 : index
    %5 = vector.load %arg2[%c0_3, %c1, %4, %c0_4, %c0_5] : memref<1x2x9x16x12xbf16, #tpu.memory_space<vmem>>, vector<1x1x8x16x12xbf16>
    %6 = vector.shape_cast %5 : vector<1x1x8x16x12xbf16> to vector<8x16x12xbf16>
    %7 = vector.extract_strided_slice %3 {offsets = [0, 0, 0], sizes = [8, 8, 12], strides = [1, 1, 1]} : vector<9x16x12xbf16> to vector<8x8x12xbf16>
    %8 = vector.extract_strided_slice %6 {offsets = [0, 0, 0], sizes = [8, 8, 12], strides = [1, 1, 1]} : vector<8x16x12xbf16> to vector<8x8x12xbf16>
    %9 = vector.extract_strided_slice %3 {offsets = [1, 0, 0], sizes = [8, 8, 12], strides = [1, 1, 1]} : vector<9x16x12xbf16> to vector<8x8x12xbf16>
    %10 = vector.shape_cast %7 : vector<8x8x12xbf16> to vector<64x12xbf16>
    %c0_6 = arith.constant 0 : index
    %c0_7 = arith.constant 0 : index
    %c0_8 = arith.constant 0 : index
    %11 = vector.load %arg3[%c0_6, %c0_7, %c0_8] : memref<3x12x8xbf16, #tpu.memory_space<vmem>>, vector<1x12x8xbf16>
    %12 = vector.shape_cast %11 : vector<1x12x8xbf16> to vector<12x8xbf16>
    %cst = arith.constant dense<0.000000e+00> : vector<64x8xf32>
    %13 = tpu.matmul %10, %12, %cst {dimension_numbers = #tpu.dot_dimension_numbers<[1], [0], [0], [1], [0, 0, 1, 1], [], []>} : vector<64x12xbf16>, vector<12x8xbf16>, vector<64x8xf32> -> vector<64x8xf32>
    %c0_9 = arith.constant 0 : index
    %c0_10 = arith.constant 0 : index
    %14 = vector.load %arg6[%c0_9, %c0_10] : memref<64x8xf32, #tpu.memory_space<vmem>>, vector<64x8xf32>
    tpu.vector_store %arg6[%c0_9, %c0_10], %13 {strides = array<i32>} : memref<64x8xf32, #tpu.memory_space<vmem>>, vector<64x8xf32>,
    %15 = vector.shape_cast %8 : vector<8x8x12xbf16> to vector<64x12xbf16>
    %c1_11 = arith.constant 1 : index
    %c0_12 = arith.constant 0 : index
    %c0_13 = arith.constant 0 : index
    %16 = vector.load %arg3[%c1_11, %c0_12, %c0_13] : memref<3x12x8xbf16, #tpu.memory_space<vmem>>, vector<1x12x8xbf16>
    %17 = vector.shape_cast %16 : vector<1x12x8xbf16> to vector<12x8xbf16>
    %cst_14 = arith.constant dense<0.000000e+00> : vector<64x8xf32>
    %18 = tpu.matmul %15, %17, %cst_14 {dimension_numbers = #tpu.dot_dimension_numbers<[1], [0], [0], [1], [0, 0, 1, 1], [], []>} : vector<64x12xbf16>, vector<12x8xbf16>, vector<64x8xf32> -> vector<64x8xf32>
    %c0_15 = arith.constant 0 : index
    %c0_16 = arith.constant 0 : index
    %19 = vector.load %arg6[%c0_15, %c0_16] : memref<64x8xf32, #tpu.memory_space<vmem>>, vector<64x8xf32>
    %20 = arith.addf %19, %18 : vector<64x8xf32>
    %c0_17 = arith.constant 0 : index
    %c0_18 = arith.constant 0 : index
    %21 = vector.load %arg6[%c0_17, %c0_18] : memref<64x8xf32, #tpu.memory_space<vmem>>, vector<64x8xf32>
    tpu.vector_store %arg6[%c0_17, %c0_18], %20 {strides = array<i32>} : memref<64x8xf32, #tpu.memory_space<vmem>>, vector<64x8xf32>,
    %22 = vector.shape_cast %9 : vector<8x8x12xbf16> to vector<64x12xbf16>
    %c2 = arith.constant 2 : index
    %c0_19 = arith.constant 0 : index
    %c0_20 = arith.constant 0 : index
    %23 = vector.load %arg3[%c2, %c0_19, %c0_20] : memref<3x12x8xbf16, #tpu.memory_space<vmem>>, vector<1x12x8xbf16>
    %24 = vector.shape_cast %23 : vector<1x12x8xbf16> to vector<12x8xbf16>
    %cst_21 = arith.constant dense<0.000000e+00> : vector<64x8xf32>
    %25 = tpu.matmul %22, %24, %cst_21 {dimension_numbers = #tpu.dot_dimension_numbers<[1], [0], [0], [1], [0, 0, 1, 1], [], []>} : vector<64x12xbf16>, vector<12x8xbf16>, vector<64x8xf32> -> vector<64x8xf32>
    %c0_22 = arith.constant 0 : index
    %c0_23 = arith.constant 0 : index
    %26 = vector.load %arg6[%c0_22, %c0_23] : memref<64x8xf32, #tpu.memory_space<vmem>>, vector<64x8xf32>
    %27 = arith.addf %26, %25 : vector<64x8xf32>
    %c0_24 = arith.constant 0 : index
    %c0_25 = arith.constant 0 : index
    %28 = vector.load %arg6[%c0_24, %c0_25] : memref<64x8xf32, #tpu.memory_space<vmem>>, vector<64x8xf32>
    tpu.vector_store %arg6[%c0_24, %c0_25], %27 {strides = array<i32>} : memref<64x8xf32, #tpu.memory_space<vmem>>, vector<64x8xf32>,
    %c0_26 = arith.constant 0 : index
    %c0_27 = arith.constant 0 : index
    %29 = vector.load %arg6[%c0_26, %c0_27] : memref<64x8xf32, #tpu.memory_space<vmem>>, vector<64x8xf32>
    %c0_28 = arith.constant 0 : index
    %c0_29 = arith.constant 0 : index
    %30 = vector.load %arg4[%c0_28, %c0_29] : memref<1x8xf32, #tpu.memory_space<vmem>>, vector<1x8xf32>
    %31 = vector.broadcast %30 : vector<1x8xf32> to vector<64x8xf32>
    %32 = arith.addf %29, %31 : vector<64x8xf32>
    %33 = vector.shape_cast %32 : vector<64x8xf32> to vector<8x8x8xf32>
    %c0_30 = arith.constant 0 : index
    %c0_31 = arith.constant 0 : index
    %c0_32 = arith.constant 0 : index
    %c0_33 = arith.constant 0 : index
    %34 = vector.load %arg5[%c0_30, %c0_31, %c0_32, %c0_33] : memref<1x8x8x8xf32, #tpu.memory_space<vmem>>, vector<1x8x8x8xf32>
    %35 = vector.shape_cast %34 : vector<1x8x8x8xf32> to vector<8x8x8xf32>
    %36 = vector.shape_cast %33 : vector<8x8x8xf32> to vector<1x8x8x8xf32>
    tpu.vector_store %arg5[%c0_30, %c0_31, %c0_32, %c0_33], %36 {strides = array<i32>} : memref<1x8x8x8xf32, #tpu.memory_space<vmem>>, vector<1x8x8x8xf32>,
    return
  }
  func.func @transform_0(%arg0: i32, %arg1: i32) -> (i32, i32, i32, i32, i32) {
    %c0_i32 = arith.constant 0 : i32
    %c0_i32_0 = arith.constant 0 : i32
    %c0_i32_1 = arith.constant 0 : i32
    %c0_i32_2 = arith.constant 0 : i32
    %c0_i32_3 = arith.constant 0 : i32
    return %arg0, %c0_i32, %c0_i32_0, %c0_i32_1, %c0_i32_2 : i32, i32, i32, i32, i32
  }
  func.func @transform_1(%arg0: i32, %arg1: i32) -> (i32, i32, i32) {
    %c0_i32 = arith.constant 0 : i32
    %c0_i32_0 = arith.constant 0 : i32
    %c0_i32_1 = arith.constant 0 : i32
    %c0_i32_2 = arith.constant 0 : i32
    return %c0_i32, %c0_i32_0, %c0_i32_1 : i32, i32, i32
  }
  func.func @transform_2(%arg0: i32, %arg1: i32) -> (i32, i32) {
    %c0_i32 = arith.constant 0 : i32
    %c0_i32_0 = arith.constant 0 : i32
    %c0_i32_1 = arith.constant 0 : i32
    return %c0_i32, %c0_i32_0 : i32, i32
  }
  func.func @transform_3(%arg0: i32, %arg1: i32) -> (i32, i32, i32, i32) {
    %c0_i32 = arith.constant 0 : i32
    %c0_i32_0 = arith.constant 0 : i32
    %c0_i32_1 = arith.constant 0 : i32
    return %arg0, %arg1, %c0_i32, %c0_i32_0 : i32, i32, i32, i32
  }
}

</mosaic_0001>

<bundles_post_ra>
// kernel: tpu_custom_call.1
= control target key start
LH: loop header
LB: loop body
LE: loop exit
PB: predicated region body
PF: predicated region fallthrough
CT: control target
= control target key end

     0   :  { %8 = vsyncpa [#allocation4], 0  ;;  %s1518_s0 = inlined_call_operand.hbm [shape: bf16[2,2,9,16,12], index: 0, kind: input, shape index: {}]   ;;  %s1519_s1 = inlined_call_operand.hbm [shape: bf16[3,12,8], index: 1, kind: input, shape index: {}]   ;;  %s1520_s2 = inlined_call_operand.hbm [shape: f32[1,8], index: 2, kind: input, shape index: {}]   ;;  %s1521_s3 = inlined_call_operand.hbm [shape: f32[2,8,8,8], index: 3, kind: output, shape index: {}]  }
   0x1   :  { %10 = vsyncpa [#allocation4 + $0x1], 0 }
   0x2   :  { %11 = vsyncpa [#allocation7], 0 }
   0x3   :  { %12 = vsyncpa [#allocation5], 0 }
   0x4   :  { %14 = vsyncpa [#allocation5 + $0x1], 0  ;;  %s1191_s12 = smov 0   ;;  %s1193_s13 = smov 0  }
   0x5   :  { %s1195_s14 = smov 0   ;;  %s1197_s15 = smov 0  }
   0x6   :  { %s1199_s16 = smov 0   ;;  %s1201_s17 = smov 0  }
   0x7 LB: > { %s780_s18 = sadd.s32 4294967295, %s1161_s17   ;;  %s781_s19 = sadd.s32 4294967294, %s1161_s17   ;;  %s1161_s17 = sphi %s1201_s17, %s20_s17   ;;  %s1157_s16 = sphi %s1199_s16, %s1543_s16   ;;  %s1153_s15 = sphi %s1197_s15, %s1542_s15   ;;  %s1149_s14 = sphi %s1195_s14, %s1541_s14   ;;  %s1145_s13 = sphi %s1193_s13, %s1540_s13   ;;  %s1141_s12 = sphi %s1191_s12, %s1539_s12  }
   0x8   : > { %p52_p0 = scmp.ne.s32.totalorder %s1145_s13, %s1141_s12  ;;  %p1225_p1 = scmp.eq.s32.totalorder %s780_s18, 0 }
   0x9   : > { %p1229_p2 = scmp.eq.s32.totalorder %s780_s18, 1  ;;  %p126_p3 = scmp.eq.s32.totalorder %s781_s19, 1 }
   0xa   : > { %s1526_s20 = scalar_select %p1225_p1, 1, 0 }
   0xb   : > { %p1235_p4 = por %p1225_p1, %p52_p0  ;;  %p782_p5 = scmp.ge.s32.totalorder %s1161_s17, 1 }
   0xc   : > { %p1240_p6 = por %p126_p3, %p52_p0  ;;  %p133_p7 = scmp.lt.s32.totalorder %s1161_s17, 3 }
   0xd   : > { %s1528_s22 = scalar_select %p1235_p4, 1, 0 }
   0xe   : > { %s1529_s23 = scalar_select %p1240_p6, 1, 0 }
   0xf   : > { %p1245_p8 = pnand %p782_p5, %p133_p7  ;;  %s1163_s25 = smov [#allocation6]  }
  0x10   : > { %s145_s26 = sshll.u32 %s1163_s25, 4  ;;  %s1164_s28 = smov [#allocation8]   ;;  %s1249_s26 = int_to_ptr.vmem [resolvable:$true] %s145_s26 }
  0x11   : > { %p899_p9 = pneg %p1245_p8  ;;  %s159_s29 = sshll.u32 %s1164_s28, 4  ;;  %s1260_s29 = int_to_ptr.vmem [resolvable:$true] %s159_s29 }
  0x12   : > { %s989_s5 = scalar_lea.hbm %s1519_s1, 384 }
  0x13   : > { %p1256_p11 = pnand %p899_p9, %p1225_p1  ;;  %p990_p12 = scmp.ne.s32.totalorder %s1519_s1, %s989_s5 }
  0x14   : > { %p996_p5 = scmp.lt.u32.totalorder %s989_s5, %s1519_s1 }
  0x15   : > { %p991_p13 = pneg %p1256_p11 }
  0x17   : > { %p992_p0 = pnand %p991_p13, %p990_p12 }
  0x19   : > { %p993_p3 = pneg %p992_p0 }
  0x1b   : > { %p998_p7 = pnand %p996_p5, %p993_p3 }
  0x1d   : > { %1001 = shalt.err (!%p998_p7)
}
  0x1e   : > { %s1002_s10 = scalar_lea.vmem %s1249_s26, 384  ;;  %p1010_p1 = scmp.lt.s32.totalorder %s1249_s26, %s1249_s26 }
  0x1f   : > { %p1003_p9 = scmp.ne.s32.totalorder %s1249_s26, %s1002_s10  ;;  %p1011_p12 = scmp.lt.s32.totalorder %s1002_s10, %s1002_s10 }
  0x21   : > { %p1005_p10 = pnand %p1003_p9, %p991_p13  ;;  %p1012_p0 = por %p1011_p12, %p1010_p1 }
  0x23   : > { %p1006_p6 = pneg %p1005_p10 }
  0x25   : > { %p1013_p4 = pnand %p1012_p0, %p1006_p6 }
  0x27   : > { %1016 = shalt.err (!%p1013_p4)
}
  0x28   : > { %s1165_s11 = smov 64   ;;  %s1166_s18 = smov 4  }
  0x29   : > { %902 = dma.hbm_to_vmem [thread:$0]  (!%p1256_p11), %s1519_s1, 384, %s1249_s26, [#allocation7], %s1165_s11, %s1165_s11, %s1166_s18  }
  0x2a   : > { %s1017_s4 = scalar_lea.hbm %s1520_s2, 16 }
  0x2b   : > { %p1018_p1 = scmp.ne.s32.totalorder %s1520_s2, %s1017_s4  ;;  %p1024_p10 = scmp.lt.u32.totalorder %s1017_s4, %s1520_s2 }
  0x2d   : > { %p1020_p4 = pnand %p1018_p1, %p991_p13 }
  0x2f   : > { %p1021_p6 = pneg %p1020_p4 }
  0x31   : > { %p1026_p3 = pnand %p1024_p10, %p1021_p6 }
  0x33   : > { %1029 = shalt.err (!%p1026_p3)
}
  0x34   : > { %s1030_s26 = scalar_lea.vmem %s1260_s29, 16  ;;  %s1037_s9 = scalar_lea.vmem %s1260_s29, 32 }
  0x35   : > { %p1031_p5 = scmp.ne.s32.totalorder %s1260_s29, %s1030_s26  ;;  %p1038_p12 = scmp.lt.s32.totalorder %s1260_s29, %s1260_s29 }
  0x36   : > { %p1039_p0 = scmp.lt.s32.totalorder %s1037_s9, %s1030_s26 }
  0x37   : > { %p1033_p7 = pnand %p1031_p5, %p991_p13 }
  0x38   : > { %p1040_p1 = por %p1039_p0, %p1038_p12 }
  0x39   : > { %p1034_p9 = pneg %p1033_p7 }
  0x3b   : > { %p1041_p4 = pnand %p1040_p1, %p1034_p9 }
  0x3d   : > { %1044 = shalt.err (!%p1041_p4)
}
  0x3e   : > { %905 = dma.hbm_to_vmem [thread:$0]  (!%p1256_p11), %s1520_s2, 16, %s1260_s29, [#allocation7]  }
  0x3f   : > { %s32_s25 = sadd.s32 1, %s1157_s16  ;;  %s39_s28 = sadd.s32 1, %s1149_s14 }
  0x40   : > { %p34_p13 = scmp.ge.s32.totalorder %s32_s25, 2  ;;  %p46_p6 = scmp.ne.s32.totalorder %s1149_s14, %s1145_s13 }
  0x41   : > { %p47_p10 = scmp.eq.s32.totalorder %s1161_s17, 0  ;;  %p916_p3 = scmp.lt.s32.totalorder %s1161_s17, 2 }
  0x42   : > { %s1545_s25 = smov (%p34_p13, %s32_s25), 0  ;;  %p1328_p7 = por %p1229_p2, %p46_p6 }
  0x43   : > { %p48_p5 = por %p47_p10, %p46_p6  ;;  %s36_s30 = ssub.s32 %s1157_s16, %s1545_s25 }
  0x44   : > { %s1532_s27 = scalar_select %p1328_p7, 1, 0 }
  0x45   : > { %s170_s4 = sand.u32 1, %s1149_s14   ;;  %p37_p9 = scmp.eq.s32.totalorder %s36_s30, 0 }
  0x46   : > { %s884_s29 = smul.u32 144, %s170_s4  ;;  %p1335_p11 = pnand %p916_p3, %p48_p5 }
  0x47   : > { %s1340_s6 = scalar_select %p37_p9, %s1149_s14, %s39_s28  }
  0x48   : > { %s885_s7 = smul.u32 2304, %s1157_s16  ;;  %s174_s8 = scalar_lea.vmem [#allocation3], %s884_s29 }
  0x49   : > { %s181_s26 = sshll.u32 %s174_s8, 4  ;;  %s1350_s19 = scalar_lea.sflag [#allocation4], %s170_s4  ;;  %s1348_s26 = int_to_ptr.vmem [resolvable:$true] %s181_s26 }
  0x4a   : > { %s1346_s10 = scalar_lea.hbm %s1518_s0, %s885_s7  ;;  %p1047_p12 = pneg %p1335_p11 }
  0x4b   : > { %s1045_s30 = scalar_lea.hbm %s1346_s10, 2304  ;;  %s1050_s7 = scalar_lea.hbm %s1518_s0, 4608 }
  0x4c   : > { %p1046_p2 = scmp.ne.s32.totalorder %s1346_s10, %s1045_s30  ;;  %p1051_p4 = scmp.lt.u32.totalorder %s1346_s10, %s1518_s0 }
  0x4d   : > { %p1052_p13 = scmp.lt.u32.totalorder %s1050_s7, %s1045_s30  ;;  %p1054_p10 = scmp.lt.u32.totalorder %s1045_s30, %s1346_s10 }
  0x4e   : > { %p1048_p0 = pnand %p1047_p12, %p1046_p2 }
  0x4f   : > { %p1053_p6 = por %p1052_p13, %p1051_p4 }
  0x50   : > { %p1049_p1 = pneg %p1048_p0 }
  0x51   : > { %p1055_p3 = por %p1054_p10, %p1053_p6 }
  0x53   : > { %p1056_p5 = pnand %p1055_p3, %p1049_p1 }
  0x55   : > { %1059 = shalt.err (!%p1056_p5)
}
  0x56   : > { %s1060_s4 = scalar_lea.vmem %s1348_s26, 2304  ;;  %s1167_s9 = smov [#allocation3]  }
  0x57   : > { %p1061_p9 = scmp.ne.s32.totalorder %s1348_s26, %s1060_s4  ;;  %s1065_s28 = sshll.u32 %s1167_s9, 4  ;;  %s1066_s28 = int_to_ptr.vmem [resolvable:$false] %s1065_s28 }
  0x58   : > { %s1067_s29 = scalar_lea.vmem %s1066_s28, 4608  ;;  %p1068_p7 = scmp.lt.s32.totalorder %s1348_s26, %s1066_s28 }
  0x59   : > { %p1063_p2 = pnand %p1061_p9, %p1047_p12  ;;  %p1069_p4 = scmp.lt.s32.totalorder %s1067_s29, %s1060_s4 }
  0x5b   : > { %p1064_p0 = pneg %p1063_p2  ;;  %p1070_p13 = por %p1069_p4, %p1068_p7 }
  0x5d   : > { %p1071_p6 = pnand %p1070_p13, %p1064_p0 }
  0x5f   : > { %1074 = shalt.err (!%p1071_p6)
}
  0x60   : > { %909 = dma.hbm_to_vmem [thread:$0]  (!%p1335_p11), %s1346_s10, 2304, %s1348_s26, %s1350_s19, %s1165_s11, %s1165_s11, %s1166_s18  }
  0x61   : > { %193 = sbr.rel (%p1245_p8) target bundleno = 383 (0x17f), region = 32  ;;  %s1384_s30 = sand.u32 (!%p1245_p8), 1, %s1145_s13  }
  0x62   : > { %s886_s7 = smul.u32 (!%p1245_p8), 144, %s1384_s30  ;;  %s196_s8 = scalar_lea.sflag (!%p1245_p8), [#allocation4], %s1384_s30 }
  0x63   : > { %p1534_p7 = scmp.ne.s32.totalorder (!%p1245_p8), %s1528_s22, 0 }
  0x64   : > { %s1388_s21 = scalar_lea.vmem (!%p1245_p8), [#allocation3], %s886_s7 }
  0x68   : > { %1128 = dma.done.wait (%p1534_p7), %s196_s8, 2304  }
  0x69   : > { %1130 = vsyncadd (%p1534_p7), %s196_s8, 4294964992  ;;  %p1535_p11 = scmp.ne.s32.totalorder %s1526_s20, 0 }
  0x6b   : > { %1132 = dma.done.wait (%p1535_p11), [#allocation7], 400  }
  0x6c   : > { %1134 = vsyncadd (%p1535_p11), [#allocation7], 4294966896  ;;  %vm296_vm0 = vcmask 1045504   ;;  %vm283_vm1 = vcmask 97280   ;;  %v974_v0 = vld [vmem:[#allocation6] sm:$0x3f]  }
  0x6d   : > { %v236_v1 = vld [vmem:[%s1388_s21] sm:$0xf]  ;;  %v237_v2 = vld [vmem:[%s1388_s21 + $0x8] sm:$0xf]  ;;  %v238_v3 = vld [vmem:[%s1388_s21 + $0x10] sm:$0xf]  ;;  %880 = vmatprep.subr.msk.bf16.mxu0 %vm296_vm0, %v974_v0  ;;  %881 = vmatprep.subr.msk.bf16.mxu1 %vm296_vm0, %v974_v0 }
  0x6e   : > { %v298_v4 = vsel %vm296_vm0, %v974_v0, 0  ;;  %v799_v5 = vcombine.low %v236_v1, %v237_v2  ;;  %v239_v6 = vld [vmem:[%s1388_s21 + $0x18] sm:$0xf]  ;;  %v240_v7 = vld [vmem:[%s1388_s21 + $0x20] sm:$0xf]  ;;  %v817_v15 = vcombine.low %v237_v2, %v238_v3  ;;  %vm365_vm2 = vcmask 64512  }
  0x6f   : > { %849 = vmatpush3.bf16.msra.mxu0 %v298_v4  ;;  %879 = vmatpush3.bf16.msra.mxu1 %v298_v4  ;;  %v241_v8 = vld [vmem:[%s1388_s21 + $0x28] sm:$0xf]  ;;  %v242_v9 = vld [vmem:[%s1388_s21 + $0x30] sm:$0xf]  ;;  %v243_v10 = vld [vmem:[%s1388_s21 + $0x38] sm:$0xf]  ;;  %v800_v11 = vcombine.low %v238_v3, %v239_v6  ;;  %v818_v19 = vcombine.low %v239_v6, %v240_v7 }
  0x70   : > { %850 = vmatprep.mubr.msk.bf16.mxu0 %vm283_vm1, %v799_v5  ;;  %v801_v12 = vcombine.low %v240_v7, %v241_v8  ;;  %v802_v13 = vcombine.low %v242_v9, %v243_v10  ;;  %v982_v14 = vld [vmem:[#allocation6 + $0x8] sm:$0x3f]   ;;  %v985_v18 = vld [vmem:[#allocation6 + $0x10] sm:$0x3f]   ;;  %v819_v21 = vcombine.low %v241_v8, %v242_v9  ;;  %s790_s20 = sshll.u32 %s1384_s30, 6  ;;  %s832_s24 = sshll.u32 %s1153_s15, 10 }
  0x71   : > { %v983_v16 = vld [vmem:[%s1388_s21 + $0x48] ss:$8 sps:$4 sm:$0xff]   ;;  %v415_v17 = vsel %vm296_vm0, %v982_v14, 0  ;;  %882 = vmatprep.subr.msk.bf16.mxu1 %vm296_vm0, %v982_v14  ;;  %883 = vmatprep.subr.msk.bf16.mxu0 %vm296_vm0, %v985_v18  ;;  %v533_v20 = vsel %vm296_vm0, %v985_v18, 0  ;;  %v984_v22 = vld [vmem:[%s1388_s21 + $0x58] ss:$8 sps:$4 sm:$0xff]   ;;  %s1464_s26 = scalar_lea.hbm %s1521_s3, %s832_s24 }
  0x72   : > { %854 = vmatprep.mubr.msk.bf16.mxu1 %vm283_vm1, %v801_v12  ;;  %851 = vmatmul.mubr.msk.bf16.vlgmr.msra.gmra.mrb[0].mxu0 %vm283_vm1, %v800_v11  ;;  %v986_v23 = vld [vmem:[%s1388_s21 + $0x68] ss:$8 sps:$4 sm:$0xff]   ;;  %v244_v24 = vld [vmem:[%s1388_s21 + $0x40] sm:$0xf]  ;;  %s229_s22 = scalar_lea.vmem [#allocation9], %s790_s20  ;;  %s656_s15 = scalar_lea.sflag [#allocation5], %s1384_s30 }
  0x73   : > { %855 = vmatmul.mubr.msk.bf16.vlgmr.msra.gmra.mrb[0].mxu1 %vm283_vm1, %v802_v13  ;;  %870 = vmatprep.mubr.msk.bf16.mxu0 %vm283_vm1, %v817_v15  ;;  %v820_v25 = vcombine.low %v243_v10, %v244_v24  ;;  %v987_v26 = vld [vmem:[%s1388_s21 + $0x78] ss:$8 sps:$4 sm:$0xff]   ;;  %s671_s11 = sshll.u32 %s229_s22, 4  ;;  %p1536_p12 = scmp.ne.s32.totalorder %s1532_s27, 0  ;;  %s1466_s11 = int_to_ptr.vmem [resolvable:$true] %s671_s11 }
  0x74   : > { %859 = vmatpush3.bf16.msra.mxu1 %v415_v17  ;;  %860 = vmatprep.mubr.msk.bf16.mxu1 %vm283_vm1, %v983_v16  ;;  %v826_v11 = vld [vmem:[#allocation8] ss:$0 sm:$0xff]  ;;  %s1075_s10 = scalar_lea.vmem %s1466_s11, 1024  ;;  %s1168_s19 = smov [#allocation9]  }
  0x75   : > { %869 = vmatpush3.bf16.msra.mxu0 %v533_v20  ;;  %p1076_p8 = scmp.ne.s32.totalorder %s1466_s11, %s1075_s10  ;;  %s1079_s4 = sshll.u32 %s1168_s19, 4  ;;  %s1080_s4 = int_to_ptr.vmem [resolvable:$false] %s1079_s4 }
  0x76   : > { %s1081_s9 = scalar_lea.vmem %s1080_s4, 2048  ;;  %p1082_p3 = scmp.lt.s32.totalorder %s1466_s11, %s1080_s4 }
  0x77   : > { %p1077_p1 = pnand %p1076_p8, %p1536_p12  ;;  %p1083_p5 = scmp.lt.s32.totalorder %s1081_s9, %s1075_s10 }
  0x79   : > { %p1078_p10 = pneg %p1077_p1  ;;  %p1084_p9 = por %p1083_p5, %p1082_p3 }
  0x7a   : > { %871 = vmatmul.mubr.msk.bf16.vlgmr.msra.gmra.mrb[4].mxu0 %vm283_vm1, %v818_v19 }
  0x7b   : > { %861 = vmatmul.mubr.msk.bf16.vlgmr.msra.gmra.mrb[4].mxu1 %vm283_vm1, %v984_v22  ;;  %874 = vmatprep.mubr.msk.bf16.mxu0 %vm283_vm1, %v819_v21  ;;  %p1085_p2 = pnand %p1084_p9, %p1078_p10 }
  0x7c   : > { %864 = vmatprep.mubr.msk.bf16.mxu1 %vm283_vm1, %v986_v23 }
  0x82   : > { %875 = vmatmul.mubr.msk.bf16.gmra.mrb[8].mxu0 %vm283_vm1, %v820_v25 }
  0x83   : > { %865 = vmatmul.mubr.msk.bf16.gmra.mrb[8].mxu1 %vm283_vm1, %v987_v26 }
 0x145   : > { %v852_v27 = vpop.f32.mrb[0].mxu0 }
 0x146   : > { %368 = vst.msk [vmem:[#allocation2 + $0x10] sm:$0xff] %vm365_vm2, %v852_v27  ;;  %v856_v28 = vpop.f32.mrb[0].mxu1  ;;  %v334_v29 = vpop.f32.mrb[1].mxu0 }
 0x147   : > { %372 = vst.msk [vmem:[#allocation2 + $0x30] sm:$0xff] %vm365_vm2, %v856_v28  ;;  %366 = vst.msk [vmem:[#allocation2] sm:$0xff] %vm365_vm2, %v334_v29  ;;  %v350_v30 = vpop.f32.mrb[1].mxu1  ;;  %v853_v31 = vpop.f32.mrb[2].mxu0 }
 0x148   : > { %370 = vst.msk [vmem:[#allocation2 + $0x20] sm:$0xff] %vm365_vm2, %v350_v30  ;;  %369 = vst.msk [vmem:[#allocation2 + $0x18] sm:$0xff] %vm365_vm2, %v853_v31  ;;  %v857_v32 = vpop.f32.mrb[2].mxu1  ;;  %v337_v33 = vpop.f32.mrb[3].mxu0 }
 0x149   : > { %373 = vst.msk [vmem:[#allocation2 + $0x38] sm:$0xff] %vm365_vm2, %v857_v32  ;;  %367 = vst.msk [vmem:[#allocation2 + $0x8] sm:$0xff] %vm365_vm2, %v337_v33  ;;  %v353_v34 = vpop.f32.mrb[3].mxu1 }
 0x14a   : > { %371 = vst.msk [vmem:[#allocation2 + $0x28] sm:$0xff] %vm365_vm2, %v353_v34 }
 0x14d   : > { %v484_v35 = vld [vmem:[#allocation2 + $0x10] sm:$0xff]  ;;  %v872_v36 = vpop.f32.mrb[4].mxu0 }
 0x14e   : > { %v862_v37 = vpop.f32.mrb[4].mxu1  ;;  %v482_v38 = vld [vmem:[#allocation2] sm:$0xff]  ;;  %v569_v39 = vpop.f32.mrb[5].mxu0  ;;  %v488_v53 = vld [vmem:[#allocation2 + $0x30] sm:$0xff] }
 0x14f   : > { %v492_v40 = vadd.f32 %v862_v37, %v484_v35  ;;  %v451_v41 = vpop.f32.mrb[5].mxu1  ;;  %v485_v42 = vld [vmem:[#allocation2 + $0x18] sm:$0xff]  ;;  %v873_v43 = vpop.f32.mrb[6].mxu0  ;;  %v486_v57 = vld [vmem:[#allocation2 + $0x20] sm:$0xff] }
 0x150   : > { %v490_v44 = vadd.f32 %v482_v38, %v451_v41  ;;  %v863_v45 = vpop.f32.mrb[6].mxu1  ;;  %v483_v46 = vld [vmem:[#allocation2 + $0x8] sm:$0xff]  ;;  %v572_v47 = vpop.f32.mrb[7].mxu0  ;;  %v489_v62 = vld [vmem:[#allocation2 + $0x38] sm:$0xff] }
 0x151   : > { %500 = vst.msk [vmem:[#allocation2 + $0x10] sm:$0xff] %vm365_vm2, %v492_v40  ;;  %v493_v48 = vadd.f32 %v863_v45, %v485_v42  ;;  %v454_v49 = vpop.f32.mrb[7].mxu1  ;;  %v487_v4 = vld [vmem:[#allocation2 + $0x28] sm:$0xff] }
 0x152   : > { %498 = vst.msk [vmem:[#allocation2] sm:$0xff] %vm365_vm2, %v490_v44  ;;  %v491_v50 = vadd.f32 %v483_v46, %v454_v49 }
 0x153   : > { %501 = vst.msk [vmem:[#allocation2 + $0x18] sm:$0xff] %vm365_vm2, %v493_v48 }
 0x154   : > { %499 = vst.msk [vmem:[#allocation2 + $0x8] sm:$0xff] %vm365_vm2, %v491_v50 }
 0x155   : > { %v876_v51 = vpop.f32.mrb[8].mxu0 }
 0x156   : > { %v866_v52 = vpop.f32.mrb[8].mxu1  ;;  %v585_v54 = vpop.f32.mrb[9].mxu0 }
 0x157   : > { %v496_v55 = vadd.f32 %v866_v52, %v488_v53  ;;  %v467_v56 = vpop.f32.mrb[9].mxu1  ;;  %v877_v58 = vpop.f32.mrb[10].mxu0 }
 0x158   : > { %v602_v59 = vld [vmem:[#allocation2 + $0x10] sm:$0xff]  ;;  %v494_v60 = vadd.f32 %v486_v57, %v467_v56  ;;  %v867_v61 = vpop.f32.mrb[10].mxu1  ;;  %v588_v63 = vpop.f32.mrb[11].mxu0 }
 0x159   : > { %504 = vst.msk [vmem:[#allocation2 + $0x30] sm:$0xff] %vm365_vm2, %v496_v55  ;;  %v610_v0 = vadd.f32 %v872_v36, %v602_v59  ;;  %v600_v1 = vld [vmem:[#allocation2] sm:$0xff]  ;;  %v497_v2 = vadd.f32 %v867_v61, %v489_v62  ;;  %v470_v3 = vpop.f32.mrb[11].mxu1 }
 0x15a   : > { %502 = vst.msk [vmem:[#allocation2 + $0x20] sm:$0xff] %vm365_vm2, %v494_v60  ;;  %v608_v5 = vadd.f32 %v600_v1, %v569_v39  ;;  %v603_v6 = vld [vmem:[#allocation2 + $0x18] sm:$0xff]  ;;  %v495_v7 = vadd.f32 %v487_v4, %v470_v3 }
 0x15b   : > { %618 = vst.msk [vmem:[#allocation2 + $0x10] sm:$0xff] %vm365_vm2, %v610_v0  ;;  %505 = vst.msk [vmem:[#allocation2 + $0x38] sm:$0xff] %vm365_vm2, %v497_v2  ;;  %v611_v8 = vadd.f32 %v873_v43, %v603_v6  ;;  %v601_v9 = vld [vmem:[#allocation2 + $0x8] sm:$0xff] }
 0x15c   : > { %616 = vst.msk [vmem:[#allocation2] sm:$0xff] %vm365_vm2, %v608_v5  ;;  %503 = vst.msk [vmem:[#allocation2 + $0x28] sm:$0xff] %vm365_vm2, %v495_v7  ;;  %v609_v10 = vadd.f32 %v601_v9, %v572_v47 }
 0x15d   : > { %619 = vst.msk [vmem:[#allocation2 + $0x18] sm:$0xff] %vm365_vm2, %v611_v8 }
 0x15e   : > { %617 = vst.msk [vmem:[#allocation2 + $0x8] sm:$0xff] %vm365_vm2, %v609_v10 }
 0x160   : > { %v606_v12 = vld [vmem:[#allocation2 + $0x30] sm:$0xff] }
 0x161   : > { %v614_v13 = vadd.f32 %v876_v51, %v606_v12  ;;  %v604_v14 = vld [vmem:[#allocation2 + $0x20] sm:$0xff] }
 0x162   : > { %v626_v15 = vld [vmem:[#allocation2 + $0x10] sm:$0xff]  ;;  %v612_v16 = vadd.f32 %v604_v14, %v585_v54  ;;  %v607_v17 = vld [vmem:[#allocation2 + $0x38] sm:$0xff] }
 0x163   : > { %v641_v18 = vadd.f32 %v826_v11, %v626_v15  ;;  %v624_v19 = vld [vmem:[#allocation2] sm:$0xff]  ;;  %622 = vst.msk [vmem:[#allocation2 + $0x30] sm:$0xff] %vm365_vm2, %v614_v13  ;;  %v615_v20 = vadd.f32 %v877_v58, %v607_v17  ;;  %v605_v21 = vld [vmem:[#allocation2 + $0x28] sm:$0xff] }
 0x164   : > { %v639_v22 = vadd.f32 %v826_v11, %v624_v19  ;;  %v627_v23 = vld [vmem:[#allocation2 + $0x18] sm:$0xff]  ;;  %620 = vst.msk [vmem:[#allocation2 + $0x20] sm:$0xff] %vm365_vm2, %v612_v16  ;;  %v613_v24 = vadd.f32 %v605_v21, %v588_v63 }
 0x165   : > { %v642_v25 = vadd.f32 %v826_v11, %v627_v23  ;;  %v625_v26 = vld [vmem:[#allocation2 + $0x8] sm:$0xff]  ;;  %623 = vst.msk [vmem:[#allocation2 + $0x38] sm:$0xff] %vm365_vm2, %v615_v20  ;;  %649 = vst.msk [vmem:[%s229_s22 + $0x10] sm:$0xff] %vm365_vm2, %v641_v18 }
 0x166   : > { %v640_v27 = vadd.f32 %v826_v11, %v625_v26  ;;  %621 = vst.msk [vmem:[#allocation2 + $0x28] sm:$0xff] %vm365_vm2, %v613_v24  ;;  %647 = vst.msk [vmem:[%s229_s22] sm:$0xff] %vm365_vm2, %v639_v22 }
 0x167   : > { %650 = vst.msk [vmem:[%s229_s22 + $0x18] sm:$0xff] %vm365_vm2, %v642_v25 }
 0x168   : > { %648 = vst.msk [vmem:[%s229_s22 + $0x8] sm:$0xff] %vm365_vm2, %v640_v27 }
 0x16a   : > { %v630_v28 = vld [vmem:[#allocation2 + $0x30] sm:$0xff] }
 0x16b   : > { %v645_v29 = vadd.f32 %v826_v11, %v630_v28  ;;  %v628_v30 = vld [vmem:[#allocation2 + $0x20] sm:$0xff] }
 0x16c   : > { %v643_v31 = vadd.f32 %v826_v11, %v628_v30  ;;  %v631_v32 = vld [vmem:[#allocation2 + $0x38] sm:$0xff] }
 0x16d   : > { %v646_v33 = vadd.f32 %v826_v11, %v631_v32  ;;  %v629_v34 = vld [vmem:[#allocation2 + $0x28] sm:$0xff]  ;;  %653 = vst.msk [vmem:[%s229_s22 + $0x30] sm:$0xff] %vm365_vm2, %v645_v29 }
 0x16e   : > { %v644_v35 = vadd.f32 %v826_v11, %v629_v34  ;;  %651 = vst.msk [vmem:[%s229_s22 + $0x20] sm:$0xff] %vm365_vm2, %v643_v31 }
 0x16f   : > { %654 = vst.msk [vmem:[%s229_s22 + $0x38] sm:$0xff] %vm365_vm2, %v646_v33 }
 0x170   : > { %652 = vst.msk [vmem:[%s229_s22 + $0x28] sm:$0xff] %vm365_vm2, %v644_v35 }
 0x171   : > { %1088 = shalt.err (!%p1085_p2)
}
 0x172   : > { %s1089_s28 = scalar_lea.hbm %s1464_s26, 1024  ;;  %s1093_s8 = scalar_lea.hbm %s1521_s3, 2048 }
 0x173   : > { %p1090_p0 = scmp.ne.s32.totalorder %s1464_s26, %s1089_s28  ;;  %p1094_p6 = scmp.lt.u32.totalorder %s1464_s26, %s1521_s3 }
 0x174   : > { %p1095_p7 = scmp.lt.u32.totalorder %s1093_s8, %s1089_s28  ;;  %p1097_p8 = scmp.lt.u32.totalorder %s1089_s28, %s1464_s26 }
 0x175   : > { %p1091_p4 = pnand %p1090_p0, %p1536_p12 }
 0x176   : > { %p1096_p11 = por %p1095_p7, %p1094_p6 }
 0x177   : > { %p1092_p13 = pneg %p1091_p4 }
 0x178   : > { %p1098_p1 = por %p1097_p8, %p1096_p11 }
 0x17a   : > { %p1099_p10 = pnand %p1098_p1, %p1092_p13 }
 0x17c   : > { %1102 = shalt.err (!%p1099_p10)
}
 0x17d   : > { %s1169_s22 = smov 128   ;;  %s1170_s24 = smov 8  }
 0x17e   : > { %897 = dma.vmem_to_hbm [thread:$0]  (%p1536_p12), %s1466_s11, 1024, %s1464_s26, %s656_s15, %s1169_s22, %s1169_s22, %s1170_s24  }
 0x17f PF: > { %s686_s18 = sand.u32 1, %s1141_s12   ;;  %p1537_p3 = scmp.ne.s32.totalorder %s1529_s23, 0 }
 0x180   : > { %p1538_p5 = scmp.ge.s32.totalorder %s1161_s17, 2  ;;  %s687_s5 = scalar_lea.sflag [#allocation5], %s686_s18 }
 0x182   : > { %p911_p9 = pnand %p1538_p5, %p1537_p3 }
 0x184   : > { %1136 = dma.done.wait (!%p911_p9), %s687_s5, 1024  }
 0x185   : > { %1138 = vsyncadd (!%p911_p9), %s687_s5, 4294966272  ;;  %s20_s17 = sadd.s32 1, %s1161_s17   ;;  %s1539_s12 = smov %s1145_s13 }
 0x186   : > { %p17_p2 = scmp.ge.s32.totalorder %s20_s17, 4   ;;  %s1540_s13 = smov %s1149_s14 }
 0x187   : > { %s1541_s14 = smov %s1340_s6  ;;  %s1542_s15 = smov %s1157_s16 }
 0x188   : > { %s1543_s16 = smov %s1545_s25  ;;  %19 = sbr.rel (!%p17_p2) target bundleno = 7 (0x7), region = 89 }
 0x18f   :  { %692 = vsyncpa [#allocation4], 1 }
 0x190   :  { %694 = vsyncpa [#allocation4 + $0x1], 1 }
 0x191   :  { %695 = vsyncpa [#allocation7], 1 }
 0x192   :  { %696 = vsyncpa [#allocation5], 1 }
 0x193   :  { %698 = vsyncpa [#allocation5 + $0x1], 1 }

</bundles_post_ra>
